<compile_context>
chip_gen: v5e
topology: v5e:2x2
jax: 0.10.0
libtpu: 0.0.40
codegen_flags: <defaults>
</compile_context>

<pallas_src>
import functools

import jax
import jax.numpy as jnp
from jax import lax
from jax.experimental import pallas as pl
from jax.experimental.pallas import tpu as pltpu


# ----------------------------------------------------------------------------
# pltpu.roll direction self-calibration (tiny probe kernel, run once, eagerly)
# ----------------------------------------------------------------------------

def _roll_matches_jnp_convention():
    """True iff pltpu.roll(x, s)[i] == x[i - s] (i.e. jnp.roll semantics)."""

    def probe_kernel(x_ref, o_ref):
        o_ref[...] = pltpu.roll(x_ref[...], shift=1, axis=1)

    x = jnp.broadcast_to(jnp.arange(128, dtype=jnp.float32), (8, 128))
    out = pl.pallas_call(
        probe_kernel, out_shape=jax.ShapeDtypeStruct((8, 128), jnp.float32)
    )(x)
    return bool(out[0, 0] == 127.0)


# ----------------------------------------------------------------------------
# Fused UNetUpBlock forward (one pallas_call)
# ----------------------------------------------------------------------------

def unet_up_block_forward(x_nchw, bridge_nchw, params, *, roll_matches_jnp=True):
    N, Cin, H, W = x_nchw.shape
    up_w = params["up_w"]                       # (Cin, Cout, 2, 2)  torch ConvT layout
    Cout = up_w.shape[1]
    Cbr = bridge_nchw.shape[1]                  # skip-connection channels
    Ho, Wo = 2 * H, 2 * W                       # spatial size after the upconv
    HW, NPIX = H * W, Ho * Wo
    K = params["c1_w"].shape[2]                 # 3  (= kernel_size + 1)
    assert K == 3 and Cin == Cout + Cbr
    f32 = jnp.float32

    # ---- ConvTranspose2d taps: wt[t = kh*2 + kw][o, ci] = up_w[ci, o, kh, kw]
    wt = jnp.transpose(up_w, (2, 3, 1, 0)).reshape(4, Cout, Cin).astype(f32)
    b_up = params["up_b"].reshape(Cout, 1).astype(f32)

    # ---- pixel-shuffle scatter matrices: S[t, y*W+x, (2y+kh)*Wo + 2x+kw] = 1
    yy = jnp.arange(H).reshape(H, 1)
    xx = jnp.arange(W).reshape(1, W)
    s_blocks = []
    for kh in range(2):
        for kw in range(2):
            dst = ((2 * yy + kh) * Wo + (2 * xx + kw)).reshape(-1)
            s_blocks.append(jax.nn.one_hot(dst, NPIX, dtype=f32))
    s_mat = jnp.stack(s_blocks, axis=0)         # (4, HW, NPIX)

    # ---- center-crop of the bridge (static offsets), lane-dense (N,Cbr,NPIX)
    BH, BW = bridge_nchw.shape[2], bridge_nchw.shape[3]
    dy, dx = (BH - Ho) // 2, (BW - Wo) // 2
    crop = bridge_nchw[:, :, dy:dy + Ho, dx:dx + Wo].reshape(N, Cbr, NPIX).astype(f32)

    # ---- conv weights per 3x3 tap; conv1 split into (up | bridge) halves
    c1_w, c2_w = params["c1_w"], params["c2_w"]
    w1u = jnp.transpose(c1_w[:, :Cout], (2, 3, 0, 1)).reshape(K * K, Cout, Cout).astype(f32)
    w1b = jnp.transpose(c1_w[:, Cout:], (2, 3, 0, 1)).reshape(K * K, Cout, Cbr).astype(f32)
    w2 = jnp.transpose(c2_w, (2, 3, 0, 1)).reshape(K * K, Cout, Cout).astype(f32)
    b1 = params["c1_b"].reshape(Cout, 1).astype(f32)
    b2 = params["c2_b"].reshape(Cout, 1).astype(f32)

    x3 = x_nchw.reshape(N, Cin, HW).astype(f32)

    def _roll_shift(sh):
        # roll amount so that out[m] = in[(m + sh) mod NPIX]
        return ((-sh) % NPIX) if roll_matches_jnp else (sh % NPIX)

    def kernel(x_ref, crop_ref, wt_ref, s_ref, bu_ref,
               w1u_ref, w1b_ref, b1_ref, w2_ref, b2_ref, o_ref):

        def conv3x3_acc(acc, in_flat, w_ref):
            # acc: (Cout, NPIX);  in_flat: (C, NPIX);  w_ref: (9, Cout, C)
            C = in_flat.shape[0]
            lane = lax.broadcasted_iota(jnp.int32, (C, NPIX), 1)
            row = lane // Wo
            col = lane % Wo
            for dh in range(3):
                for dw in range(3):
                    k = dh * 3 + dw
                    sh = (dh - 1) * Wo + (dw - 1)
                    if sh == 0:
                        slab = in_flat
                    else:
                        slab = pltpu.roll(in_flat, shift=_roll_shift(sh), axis=1)
                    # boundary masks == zero padding of the 3x3 conv
                    conds = []
                    if dh == 0:
                        conds.append(row >= 1)
                    if dh == 2:
                        conds.append(row <= Ho - 2)
                    if dw == 0:
                        conds.append(col >= 1)
                    if dw == 2:
                        conds.append(col <= Wo - 2)
                    if conds:
                        m = conds[0]
                        for c in conds[1:]:
                            m = jnp.logical_and(m, c)
                        slab = jnp.where(m, slab, 0.0)
                    acc = acc + jnp.dot(w_ref[k], slab,
                                        preferred_element_type=f32)
            return acc

        # ---- up = ConvTranspose2d(k=2, s=2)(x); pixel shuffle stays in VMEM
        x = x_ref[...]                                              # (Cin, HW)
        up = jnp.zeros((Cout, NPIX), f32)
        for t in range(4):
            ut = jnp.dot(wt_ref[t], x, preferred_element_type=f32)  # (Cout, HW)
            up = up + jnp.dot(ut, s_ref[t], preferred_element_type=f32)
        up = up + bu_ref[...]

        # ---- conv1 (3x3, pad 1) + ReLU; channel concat replaced by weight split
        acc1 = jnp.zeros((Cout, NPIX), f32) + b1_ref[...]
        acc1 = conv3x3_acc(acc1, up, w1u_ref)
        acc1 = conv3x3_acc(acc1, crop_ref[...], w1b_ref)
        h1 = jnp.maximum(acc1, 0.0)

        # ---- conv2 (3x3, pad 1) + ReLU
        acc2 = jnp.zeros((Cout, NPIX), f32) + b2_ref[...]
        acc2 = conv3x3_acc(acc2, h1, w2_ref)
        o_ref[...] = jnp.maximum(acc2, 0.0)                         # (Cout, 256) lane-dense store

    out3 = pl.pallas_call(
        kernel,
        out_shape=jax.ShapeDtypeStruct((N, Cout, NPIX), f32),
        grid=(N,),
        in_specs=[
            pl.BlockSpec((None, Cin, HW), lambda n: (n, 0, 0)),      # x (per batch)
            pl.BlockSpec((None, Cbr, NPIX), lambda n: (n, 0, 0)),    # cropped bridge
            pl.BlockSpec((4, Cout, Cin), lambda n: (0, 0, 0)),       # ConvT taps
            pl.BlockSpec((4, HW, NPIX), lambda n: (0, 0, 0)),        # scatter matrices
            pl.BlockSpec((Cout, 1), lambda n: (0, 0)),               # up bias
            pl.BlockSpec((K * K, Cout, Cout), lambda n: (0, 0, 0)),  # conv1 (up half)
            pl.BlockSpec((K * K, Cout, Cbr), lambda n: (0, 0, 0)),   # conv1 (bridge half)
            pl.BlockSpec((Cout, 1), lambda n: (0, 0)),               # conv1 bias
            pl.BlockSpec((K * K, Cout, Cout), lambda n: (0, 0, 0)),  # conv2
            pl.BlockSpec((Cout, 1), lambda n: (0, 0)),               # conv2 bias
        ],
        out_specs=pl.BlockSpec((None, Cout, NPIX), lambda n: (n, 0, 0)),
        compiler_params=pltpu.CompilerParams(
            dimension_semantics=("parallel",),   # batch split across TCs (v7x megacore)
        ),
    )(x3, crop, wt, s_mat, b_up, w1u, w1b, b1, w2, b2)

    return out3.reshape(N, Cout, Ho, Wo)


# ----------------------------------------------------------------------------
# Pure-JAX reference (mirrors the PyTorch forward exactly, NCHW)
# ----------------------------------------------------------------------------

def reference_forward(x, bridge, params):
    N, Cin, H, W = x.shape
    up_w = params["up_w"]
    Cout = up_w.shape[1]
    t = jnp.einsum("nchw,cokl->nohkwl", x, up_w)
    up = t.reshape(N, Cout, 2 * H, 2 * W) + params["up_b"][None, :, None, None]

    bh, bw = bridge.shape[2], bridge.shape[3]
    th, tw = up.shape[2], up.shape[3]
    dy = (bh - th) // 2
    dx = (bw - tw) // 2
    crop1 = bridge[:, :, dy:dy + th, dx:dx + tw]

    out = jnp.concatenate([up, crop1], axis=1)
    pad = params["c1_w"].shape[2] // 2

    def conv_relu(o, w, b):
        o = lax.conv_general_dilated(
            o, w, window_strides=(1, 1),
            padding=((pad, pad), (pad, pad)),
            dimension_numbers=("NCHW", "OIHW", "NCHW"),
        ) + b[None, :, None, None]
        return jnp.maximum(o, 0.0)

    out = conv_relu(out, params["c1_w"], params["c1_b"])
    out = conv_relu(out, params["c2_w"], params["c2_b"])
    return out


# ----------------------------------------------------------------------------
# Main
# ----------------------------------------------------------------------------

if __name__ == "__main__":
    # UNetUpBlock(in_size=8, out_size=4, up_mode='upconv', padding=True,
    #             batch_norm=False, kernel_size=2)
    # -> conv block uses kernel 3x3 with padding 1.
    in_size, out_size = 8, 4
    kernel_size = 2
    K = kernel_size + 1

    key = jax.random.PRNGKey(0)
    keys = jax.random.split(key, 8)

    params = {
        # ConvTranspose2d weight layout: (in_channels, out_channels, kH, kW)
        "up_w": jax.random.normal(keys[0], (in_size, out_size, 2, 2), jnp.float32) * 0.1,
        "up_b": jax.random.normal(keys[1], (out_size,), jnp.float32) * 0.1,
        # Conv2d weight layout: (out_channels, in_channels, kH, kW)
        "c1_w": jax.random.normal(keys[2], (out_size, in_size, K, K), jnp.float32) * 0.1,
        "c1_b": jax.random.normal(keys[3], (out_size,), jnp.float32) * 0.1,
        "c2_w": jax.random.normal(keys[4], (out_size, out_size, K, K), jnp.float32) * 0.1,
        "c2_b": jax.random.normal(keys[5], (out_size,), jnp.float32) * 0.1,
    }

    # x: decoder feature (NCHW); bridge: skip connection (larger spatial ->
    # exercises center_crop).
    x = jax.random.normal(keys[6], (2, in_size, 8, 8), jnp.float32)
    bridge = jax.random.normal(keys[7], (2, out_size, 20, 20), jnp.float32)

    roll_dir = _roll_matches_jnp_convention()
    fwd = jax.jit(functools.partial(unet_up_block_forward,
                                    roll_matches_jnp=roll_dir))

    out = jax.block_until_ready(fwd(x, bridge, params))
    ref = jax.block_until_ready(reference_forward(x, bridge, params))

    assert out.shape == (2, out_size, 16, 16), out.shape
    max_err = float(jnp.max(jnp.abs(out - ref)))
    assert jnp.allclose(out, ref, atol=2e-4, rtol=2e-4), max_err
    print("KERNEL_OK")
</pallas_src>

<mosaic_0001>
module attributes {stable_mosaic.version = 11 : i64} {
  func.func @probe_kernel(%arg0: memref<8x128xf32, #tpu.memory_space<vmem>>, %arg1: memref<8x128xf32, #tpu.memory_space<vmem>>) attributes {dimension_semantics = [], scalar_prefetch = 0 : i64, scratch_operands = 0 : i64, tpu.core_type = #tpu.core_type<tc>} {
    %c0 = arith.constant 0 : index
    %c0_0 = arith.constant 0 : index
    %0 = vector.load %arg0[%c0, %c0_0] : memref<8x128xf32, #tpu.memory_space<vmem>>, vector<8x128xf32>
    %c1_i32 = arith.constant 1 : i32
    %1 = tpu.dynamic_rotate %0 by %c1_i32 dim 1 : vector<8x128xf32>, i32 -> vector<8x128xf32>
    %c0_1 = arith.constant 0 : index
    %c0_2 = arith.constant 0 : index
    %2 = vector.load %arg1[%c0_1, %c0_2] : memref<8x128xf32, #tpu.memory_space<vmem>>, vector<8x128xf32>
    tpu.vector_store %arg1[%c0_1, %c0_2], %1 {strides = array<i32>} : memref<8x128xf32, #tpu.memory_space<vmem>>, vector<8x128xf32>,
    return
  }
}

</mosaic_0001>

<bundles_post_ra>
// kernel: tpu_custom_call.1
= control target key start
LH: loop header
LB: loop body
LE: loop exit
PB: predicated region body
PF: predicated region fallthrough
CT: control target
= control target key end

     0   :  { %6 = vsyncpa [#allocation3], 0  ;;  %s118_s0 = inlined_call_operand.hbm [shape: f32[8,128], index: 0, kind: input, shape index: {}]   ;;  %s119_s1 = inlined_call_operand.hbm [shape: f32[8,128], index: 1, kind: output, shape index: {}]  }
   0x1   :  { %7 = vsyncpa [#allocation4], 0  ;;  %s13_s8 = sshll.u32 %s118_s0, 4  ;;  %s99_s9 = smov [#allocation2]   ;;  %s14_s8 = int_to_ptr.hbm [resolvable:$true] %s13_s8 }
   0x2   :  { %s15_s10 = sshll.u32 %s99_s9, 4  ;;  %s16_s10 = int_to_ptr.vmem [resolvable:$true] %s15_s10 }
   0x3   :  { %18 = dma.hbm_to_vmem [thread:$0]  %s14_s8, 128, %s16_s10, [#allocation3]  }
   0x4   :  { %95 = dma.done.wait [#allocation3], 128  }
   0x5   :  { %96 = vsyncadd [#allocation3], 4294967168  ;;  %v23_v0 = vld [vmem:[#allocation2] sm:$0xff]  ;;  %s100_s11 = smov 1   ;;  %s101_s12 = smov [#allocation5]  }
   0x6   :  { %24 = vrot.lane.b32.xlu0 %v23_v0, %s100_s11  ;;  %s32_s13 = sshll.u32 %s101_s12, 4  ;;  %s34_s16 = sshll.u32 %s119_s1, 4  ;;  %s33_s13 = int_to_ptr.vmem [resolvable:$true] %s32_s13  ;;  %s35_s16 = int_to_ptr.hbm [resolvable:$true] %s34_s16 }
  0x78   :  { %v25_v1 = vpop.permute.xlu0 %24 }
  0x79   :  { %26 = vst [vmem:[#allocation5] sm:$0xff] %v25_v1 }
  0x7a   :  { %37 = dma.vmem_to_hbm [thread:$0]  %s33_s13, 128, %s35_s16, [#allocation4]  }
  0x7b   :  { %97 = dma.done.wait [#allocation4], 128  }
  0x7c   :  { %98 = vsyncadd [#allocation4], 4294967168 }
  0x7d   :  { %42 = vsyncpa [#allocation3], 1 }
  0x7e   :  { %43 = vsyncpa [#allocation4], 1 }

</bundles_post_ra>
